<compile_context>
chip_gen: v6e
topology: v6e:2x2x1
jax: 0.10.0
libtpu: 0.0.40
codegen_flags: <defaults>
</compile_context>

<pallas_src>
import jax
import jax.numpy as jnp
from jax.experimental import pallas as pl
from jax.experimental.pallas import tpu as pltpu

INPUT_SIZE = 60
HIDDEN_SIZE = 40
OUTPUT_SIZE = 2

# Batch tile: >=512 rows reaches ~85% of HBM roofline on the streamed x tile,
# and 2 buffers * (512*60 + 512*2) * 4 B ~= 0.25 MiB fits easily even in v7x's
# 64 MiB VMEM alongside the resident weights.
DEFAULT_BLOCK_B = 512


def mlp_kernel(x_ref, w1_ref, b1_ref, w2_ref, b2_ref, o_ref):
    # Linear 1 + ReLU
    x = x_ref[...]                                                 # (TB, in)
    h = jnp.dot(x, w1_ref[...], preferred_element_type=jnp.float32)
    h = h + b1_ref[...]                                            # broadcast (1, hidden)
    h = jnp.maximum(h, 0.0)                                        # ReLU (VPU)
    # Linear 2 + Sigmoid
    y = jnp.dot(h.astype(w2_ref.dtype), w2_ref[...],
                preferred_element_type=jnp.float32)
    y = y + b2_ref[...]                                            # broadcast (1, out)
    # sigmoid(y) = 1 / (1 + exp(-y)); exp -> EUP, divide -> EUP reciprocal slot.
    y = pl.reciprocal(1.0 + jnp.exp(-y), approx=True)
    o_ref[...] = y.astype(o_ref.dtype)


def mlp_sonar_forward(x, w1, b1, w2, b2, *, block_b=DEFAULT_BLOCK_B,
                      use_bf16_matmul=False):
    """Fused MLP forward. x: (B, 60) f32. Returns (B, 2) f32."""
    B = x.shape[0]

    if use_bf16_matmul:
        # Halves HBM traffic for x (the only array whose DMA scales with B)
        # and uses the bf16-native MXU on v6e/v7x. Accumulation stays f32.
        x = x.astype(jnp.bfloat16)
        w1 = w1.astype(jnp.bfloat16)
        w2 = w2.astype(jnp.bfloat16)

    # Batch tile: multiple of 8 sublanes, no bigger than needed for small B.
    tb = min(block_b, max(8, ((B + 7) // 8) * 8))
    padded_b = ((B + tb - 1) // tb) * tb
    if padded_b != B:
        x = jnp.pad(x, ((0, padded_b - B), (0, 0)))
    nb = padded_b // tb

    out = pl.pallas_call(
        mlp_kernel,
        out_shape=jax.ShapeDtypeStruct((padded_b, OUTPUT_SIZE), jnp.float32),
        grid=(nb,),
        in_specs=[
            # x tiles stream through the pipeline (double-buffered by Pallas).
            pl.BlockSpec((tb, INPUT_SIZE), lambda i: (i, 0)),
            # Weights / biases: same block for every grid step -> VMEM-resident,
            # DMA'd from HBM exactly once.
            pl.BlockSpec((INPUT_SIZE, HIDDEN_SIZE), lambda i: (0, 0)),
            pl.BlockSpec((1, HIDDEN_SIZE), lambda i: (0, 0)),
            pl.BlockSpec((HIDDEN_SIZE, OUTPUT_SIZE), lambda i: (0, 0)),
            pl.BlockSpec((1, OUTPUT_SIZE), lambda i: (0, 0)),
        ],
        out_specs=pl.BlockSpec((tb, OUTPUT_SIZE), lambda i: (i, 0)),
        compiler_params=pltpu.CompilerParams(
            # Batch tiles are independent -> shard across TCs on v7x megacore.
            dimension_semantics=("parallel",),
        ),
    )(x, w1, b1, w2, b2)

    return out[:B]


def init_params(key):
    # Mimics torch.nn.Linear default init: uniform(-1/sqrt(fan_in), 1/sqrt(fan_in)).
    k1, k2, k3, k4 = jax.random.split(key, 4)
    bound1 = 1.0 / jnp.sqrt(INPUT_SIZE)
    bound2 = 1.0 / jnp.sqrt(HIDDEN_SIZE)
    w1 = jax.random.uniform(k1, (INPUT_SIZE, HIDDEN_SIZE), jnp.float32, -bound1, bound1)
    b1 = jax.random.uniform(k2, (1, HIDDEN_SIZE), jnp.float32, -bound1, bound1)
    w2 = jax.random.uniform(k3, (HIDDEN_SIZE, OUTPUT_SIZE), jnp.float32, -bound2, bound2)
    b2 = jax.random.uniform(k4, (1, OUTPUT_SIZE), jnp.float32, -bound2, bound2)
    return w1, b1, w2, b2


def reference_forward(x, w1, b1, w2, b2):
    h = jnp.maximum(x @ w1 + b1, 0.0)
    return jax.nn.sigmoid(h @ w2 + b2)


if __name__ == "__main__":
    key = jax.random.PRNGKey(0)
    kx, kp = jax.random.split(key)
    w1, b1, w2, b2 = init_params(kp)

    # Small batch: single grid step.
    batch = 8
    x = jax.random.normal(kx, (batch, INPUT_SIZE), jnp.float32)
    out = jax.block_until_ready(mlp_sonar_forward(x, w1, b1, w2, b2))
    ref = reference_forward(x, w1, b1, w2, b2)
    assert out.shape == (batch, OUTPUT_SIZE)
    # Tolerance covers the approx (EUP) reciprocal in the sigmoid.
    assert jnp.allclose(out, ref, atol=2e-3, rtol=2e-3)

    # Slightly larger, non-multiple batch: exercises the batch grid + padding path.
    batch2 = 20
    x2 = jax.random.normal(jax.random.PRNGKey(1), (batch2, INPUT_SIZE), jnp.float32)
    out2 = jax.block_until_ready(
        mlp_sonar_forward(x2, w1, b1, w2, b2, block_b=8))
    ref2 = reference_forward(x2, w1, b1, w2, b2)
    assert out2.shape == (batch2, OUTPUT_SIZE)
    assert jnp.allclose(out2, ref2, atol=2e-3, rtol=2e-3)

    print("KERNEL_OK")
</pallas_src>

<mosaic_0001>
module attributes {stable_mosaic.version = 11 : i64} {
  func.func @mlp_kernel(%arg0: i32, %arg1: memref<8x60xf32, #tpu.memory_space<vmem>>, %arg2: memref<60x40xf32, #tpu.memory_space<vmem>>, %arg3: memref<1x40xf32, #tpu.memory_space<vmem>>, %arg4: memref<40x2xf32, #tpu.memory_space<vmem>>, %arg5: memref<1x2xf32, #tpu.memory_space<vmem>>, %arg6: memref<8x2xf32, #tpu.memory_space<vmem>>) attributes {dimension_semantics = [#tpu.dimension_semantics<parallel>], iteration_bounds = array<i64: 1>, scalar_prefetch = 0 : i64, scratch_operands = 0 : i64, tpu.core_type = #tpu.core_type<tc>, window_params = [{transform_indices = @transform_0, window_bounds = array<i64: 8, 60>}, {pipeline_mode = #tpu.pipeline_mode<synchronous>, transform_indices = @transform_1, window_bounds = array<i64: 60, 40>}, {pipeline_mode = #tpu.pipeline_mode<synchronous>, transform_indices = @transform_2, window_bounds = array<i64: 1, 40>}, {pipeline_mode = #tpu.pipeline_mode<synchronous>, transform_indices = @transform_3, window_bounds = array<i64: 40, 2>}, {pipeline_mode = #tpu.pipeline_mode<synchronous>, transform_indices = @transform_4, window_bounds = array<i64: 1, 2>}, {transform_indices = @transform_5, window_bounds = array<i64: 8, 2>}]} {
    %c0 = arith.constant 0 : index
    %c0_0 = arith.constant 0 : index
    %0 = vector.load %arg1[%c0, %c0_0] : memref<8x60xf32, #tpu.memory_space<vmem>>, vector<8x60xf32>
    %c0_1 = arith.constant 0 : index
    %c0_2 = arith.constant 0 : index
    %1 = vector.load %arg2[%c0_1, %c0_2] : memref<60x40xf32, #tpu.memory_space<vmem>>, vector<60x40xf32>
    %cst = arith.constant dense<0.000000e+00> : vector<8x40xf32>
    %2 = tpu.matmul %0, %1, %cst {dimension_numbers = #tpu.dot_dimension_numbers<[1], [0], [0], [1], [0, 0, 1, 1], [], []>} : vector<8x60xf32>, vector<60x40xf32>, vector<8x40xf32> -> vector<8x40xf32>
    %c0_3 = arith.constant 0 : index
    %c0_4 = arith.constant 0 : index
    %3 = vector.load %arg3[%c0_3, %c0_4] : memref<1x40xf32, #tpu.memory_space<vmem>>, vector<1x40xf32>
    %4 = vector.broadcast %3 : vector<1x40xf32> to vector<8x40xf32>
    %5 = arith.addf %2, %4 : vector<8x40xf32>
    %cst_5 = arith.constant 0.000000e+00 : f32
    %6 = vector.broadcast %cst_5 : f32 to vector<8x40xf32>
    %7 = arith.maximumf %5, %6 : vector<8x40xf32>
    %c0_6 = arith.constant 0 : index
    %c0_7 = arith.constant 0 : index
    %8 = vector.load %arg4[%c0_6, %c0_7] : memref<40x2xf32, #tpu.memory_space<vmem>>, vector<40x2xf32>
    %cst_8 = arith.constant dense<0.000000e+00> : vector<8x2xf32>
    %9 = tpu.matmul %7, %8, %cst_8 {dimension_numbers = #tpu.dot_dimension_numbers<[1], [0], [0], [1], [0, 0, 1, 1], [], []>} : vector<8x40xf32>, vector<40x2xf32>, vector<8x2xf32> -> vector<8x2xf32>
    %c0_9 = arith.constant 0 : index
    %c0_10 = arith.constant 0 : index
    %10 = vector.load %arg5[%c0_9, %c0_10] : memref<1x2xf32, #tpu.memory_space<vmem>>, vector<1x2xf32>
    %11 = vector.broadcast %10 : vector<1x2xf32> to vector<8x2xf32>
    %12 = arith.addf %9, %11 : vector<8x2xf32>
    %cst_11 = arith.constant 0.000000e+00 : f32
    %13 = vector.broadcast %cst_11 : f32 to vector<8x2xf32>
    %14 = arith.subf %13, %12 : vector<8x2xf32>
    %15 = math.exp %14 : vector<8x2xf32>
    %cst_12 = arith.constant 1.000000e+00 : f32
    %16 = vector.broadcast %cst_12 : f32 to vector<8x2xf32>
    %17 = arith.addf %16, %15 : vector<8x2xf32>
    %18 = tpu.reciprocal %17 {approx = true} : vector<8x2xf32> -> vector<8x2xf32>
    %c0_13 = arith.constant 0 : index
    %c0_14 = arith.constant 0 : index
    %19 = vector.load %arg6[%c0_13, %c0_14] : memref<8x2xf32, #tpu.memory_space<vmem>>, vector<8x2xf32>
    tpu.vector_store %arg6[%c0_13, %c0_14], %18 {strides = array<i32>} : memref<8x2xf32, #tpu.memory_space<vmem>>, vector<8x2xf32>,
    return
  }
  func.func @transform_0(%arg0: i32) -> (i32, i32) {
    %c0_i32 = arith.constant 0 : i32
    %c0_i32_0 = arith.constant 0 : i32
    return %arg0, %c0_i32 : i32, i32
  }
  func.func @transform_1(%arg0: i32) -> (i32, i32) {
    %c0_i32 = arith.constant 0 : i32
    %c0_i32_0 = arith.constant 0 : i32
    %c0_i32_1 = arith.constant 0 : i32
    return %c0_i32, %c0_i32_0 : i32, i32
  }
  func.func @transform_2(%arg0: i32) -> (i32, i32) {
    %c0_i32 = arith.constant 0 : i32
    %c0_i32_0 = arith.constant 0 : i32
    %c0_i32_1 = arith.constant 0 : i32
    return %c0_i32, %c0_i32_0 : i32, i32
  }
  func.func @transform_3(%arg0: i32) -> (i32, i32) {
    %c0_i32 = arith.constant 0 : i32
    %c0_i32_0 = arith.constant 0 : i32
    %c0_i32_1 = arith.constant 0 : i32
    return %c0_i32, %c0_i32_0 : i32, i32
  }
  func.func @transform_4(%arg0: i32) -> (i32, i32) {
    %c0_i32 = arith.constant 0 : i32
    %c0_i32_0 = arith.constant 0 : i32
    %c0_i32_1 = arith.constant 0 : i32
    return %c0_i32, %c0_i32_0 : i32, i32
  }
  func.func @transform_5(%arg0: i32) -> (i32, i32) {
    %c0_i32 = arith.constant 0 : i32
    %c0_i32_0 = arith.constant 0 : i32
    return %arg0, %c0_i32 : i32, i32
  }
}

</mosaic_0001>

<bundles_post_ra>
// kernel: tpu_custom_call.1
= control target key start
LH: loop header
LB: loop body
LE: loop exit
PB: predicated region body
PF: predicated region fallthrough
CT: control target
= control target key end

     0   :  { %vm40_vm0 = vcmask 1043456   ;;  %v270_v0 = vmov 0.0   ;;  %vm271_vm1 = vmmov 0   ;;  %vm36_vm2 = vcmask 490496   ;;  %s353_s1 = inlined_call_operand.vmem [shape: f32[60,40], index: 1, kind: input, shape index: {}]   ;;  %s354_s3 = inlined_call_operand.vmem [shape: f32[40,2], index: 3, kind: input, shape index: {}]   ;;  %s355_s0 = inlined_call_operand.vmem [shape: f32[8,60], index: 0, kind: input, shape index: {}]   ;;  %s356_s2 = inlined_call_operand.vmem [shape: f32[1,40], index: 2, kind: input, shape index: {}]   ;;  %s357_s4 = inlined_call_operand.vmem [shape: f32[1,2], index: 4, kind: input, shape index: {}]   ;;  %s358_s5 = inlined_call_operand.vmem [shape: f32[8,2], index: 5, kind: output, shape index: {}]  }
   0x1   :  { %232 = vmatprep.subr.mxu0 %v270_v0  ;;  %v28_v1 = vld [vmem:[%s353_s1 + $0x38] sm:$0xf]  ;;  %v27_v2 = vld [vmem:[%s353_s1 + $0x30] sm:$0xff]  ;;  %248 = vmatprep.mubr.msk.f32.mxu0 %vm271_vm1, %v270_v0  ;;  %v26_v3 = vld [vmem:[%s353_s1 + $0x28] sm:$0xff]  ;;  %vm127_vm3 = vcmask 326656   ;;  %vm206_vm4 = vcmask 15360  }
   0x2   :  { %233 = vmatpush3.msk.msra.mxu0 %vm40_vm0, %v28_v1  ;;  %251 = vmatprep.subr.mxu1 %v270_v0  ;;  %v119_v4 = vld [vmem:[%s354_s3 + $0x20] sm:$0xff]  ;;  %v118_v5 = vld [vmem:[%s354_s3 + $0x18] sm:$0xff]  ;;  %v23_v8 = vld [vmem:[%s353_s1 + $0x10] sm:$0xff] }
   0x3   :  { %234 = vmatprep.subr.mxu0 %v270_v0  ;;  %261 = vmatprep.mubr.msk.f32.mxu1 %vm271_vm1, %v270_v0  ;;  %v25_v6 = vld [vmem:[%s353_s1 + $0x20] sm:$0xff]  ;;  %v24_v7 = vld [vmem:[%s353_s1 + $0x18] sm:$0xff]  ;;  %v22_v9 = vld [vmem:[%s353_s1 + $0x8] sm:$0xff] }
   0x4   :  { %235 = vmatpush3.msra.mxu0 %v27_v2  ;;  %252 = vmatpush3.msra.mxu1 %v119_v4  ;;  %v21_v10 = vld [vmem:[%s353_s1] sm:$0xff]  ;;  %v117_v12 = vld [vmem:[%s354_s3 + $0x10] sm:$0xff]  ;;  %v116_v13 = vld [vmem:[%s354_s3 + $0x8] sm:$0xff] }
   0x5   :  { %236 = vmatprep.subr.mxu0 %v270_v0  ;;  %253 = vmatprep.subr.mxu1 %v270_v0  ;;  %v20_v11 = vld [vmem:[%s355_s0] sm:$0xff] }
   0x6   :  { %237 = vmatpush3.msra.mxu0 %v26_v3  ;;  %254 = vmatpush3.msra.mxu1 %v118_v5  ;;  %v115_v14 = vld [vmem:[%s354_s3] sm:$0xff] }
   0x7   :  { %238 = vmatprep.subr.mxu0 %v270_v0  ;;  %255 = vmatprep.subr.mxu1 %v270_v0  ;;  %v212_v15 = vld [vmem:[%s356_s2] ss:$0 sm:$0xff] }
   0x8   :  { %239 = vmatpush3.msra.mxu0 %v25_v6  ;;  %256 = vmatpush3.msra.mxu1 %v117_v12  ;;  %v215_v20 = vld [vmem:[%s357_s4] ss:$0 sm:$0xff] }
   0x9   :  { %240 = vmatprep.subr.mxu0 %v270_v0  ;;  %257 = vmatprep.subr.mxu1 %v270_v0 }
   0xa   :  { %241 = vmatpush3.msra.mxu0 %v24_v7  ;;  %258 = vmatpush3.msra.mxu1 %v116_v13 }
   0xb   :  { %242 = vmatprep.subr.mxu0 %v270_v0  ;;  %259 = vmatprep.subr.mxu1 %v270_v0 }
   0xc   :  { %243 = vmatpush3.msra.mxu0 %v23_v8  ;;  %260 = vmatpush3.msra.mxu1 %v115_v14 }
   0xd   :  { %244 = vmatprep.subr.mxu0 %v270_v0 }
   0xe   :  { %245 = vmatpush3.msra.mxu0 %v22_v9 }
   0xf   :  { %246 = vmatprep.subr.mxu0 %v270_v0 }
  0x10   :  { %247 = vmatpush3.msra.mxu0 %v21_v10 }
  0x11   :  { %249 = vmatmul.mubr.msk.f32.vlgmr.msra.gmra.mxu0 %vm36_vm2, %v20_v11 }
  0xd1   :  { %v110_v16 = vpop.f32.mrf.mxu0 }
  0xd2   :  { %v111_v17 = vadd.f32 %v212_v15, %v110_v16 }
  0xd3   :  { %v250_v18 = vpop.f32.mrf.mxu0 }
  0xd4   :  { %v114_v19 = vmax.f32 %v111_v17, 0.0 }
  0xd6   :  { %262 = vmatmul.mubr.msk.f32.vlgmr.msra.gmra.mxu1 %vm127_vm3, %v114_v19 }
 0x196   :  { %v197_v21 = vpop.f32.mrf.mxu1 }
 0x197   :  { %v198_v22 = vadd.f32 %v215_v20, %v197_v21 }
 0x198   :  { %v263_v23 = vpop.f32.mrf.mxu1 }
 0x199   :  { %v201_v24 = vsub.f32 0.0, %v198_v22 }
 0x19b   :  { %v202_v25 = vmul.f32 1.442695, %v201_v24 }
 0x19d   :  { %266 = vpow2.f32 %v202_v25 }
 0x1aa   :  { %v267_v26 = vpop.eup %266 }
 0x1ab   :  { %v204_v27 = vadd.f32 1.0, %v267_v26 }
 0x1ad   :  { %268 = vrcp.f32 %v204_v27 }
 0x1ba   :  { %v269_v28 = vpop.eup %268 }
 0x1bb   :  { %207 = vst.msk [vmem:[%s358_s5] sm:$0xff] %vm206_vm4, %v269_v28 }

</bundles_post_ra>
